<compile_context>
chip_gen: v5e
topology: v5e:2x2
jax: 0.10.0
libtpu: 0.0.40
codegen_flags: <defaults>
</compile_context>

<pallas_src>
import functools

import jax
import jax.numpy as jnp
from jax.experimental import pallas as pl
from jax.experimental.pallas import tpu as pltpu

_EPS = 1e-12  # F.normalize default eps


def _power_iter_kernel(w_ref, u_ref, u_out_ref, w_scaled_ref, *,
                       power_iterations):
    """Power iteration on the (OC, CKK) weight; emits u_new and W / sigma."""
    w = w_ref[...]                         # (OC, CKK)
    u = u_ref[...]                         # (1, OC)
    wu = u                                 # overwritten (power_iterations >= 1)
    for _ in range(power_iterations):
        # v = normalize(W^T u): contract on OC — no transpose materialized.
        wv = jax.lax.dot_general(u, w, (((1,), (0,)), ((), ())),
                                 preferred_element_type=jnp.float32)  # (1,CKK)
        v = wv / jnp.maximum(jnp.sqrt(jnp.sum(wv * wv)), _EPS)
        # u = normalize(W v): contract on CKK (axis 1 of both operands).
        wu = jax.lax.dot_general(v, w, (((1,), (1,)), ((), ())),
                                 preferred_element_type=jnp.float32)  # (1,OC)
        u = wu / jnp.maximum(jnp.sqrt(jnp.sum(wu * wu)), _EPS)
    sigma = jnp.sum(u * wu)                # u . (W v)
    u_out_ref[...] = u
    w_scaled_ref[...] = w * (1.0 / sigma)  # pre-scaled weight for the conv


def _conv_band_kernel(w_ref, b_ref, m_ref, x_ref, o_ref, *, H, W, KH, KW):
    """One batch element of the conv, expressed as a single matmul.

    x_ref : (1, C, L)      row-flattened, front-padded input band (resident)
    w_ref : (OC, KH*KW*C)  pre-scaled weight, tap-major column order
    m_ref : (2, H*W)       lane masks killing the width-wrap columns
    o_ref : (1, OC, H*W)   lane-dense output tile
    """
    Q = H * W
    band = x_ref[0]                        # (C, L)
    mask_l = m_ref[0:1, :]                 # (1, Q)  — zeros at columns w == 0
    mask_r = m_ref[1:2, :]                 # (1, Q)  — zeros at columns w == W-1
    cols = []
    for dh in range(KH):
        for dw in range(KW):
            off = dh * W + dw              # shifted view == tap (dh, dw)
            sl = band[:, off:off + Q]      # (C, Q) static lane slice
            if dw == 0:
                sl = sl * mask_l           # column w=0 would wrap to the
            elif dw == KW - 1:             # previous row's last column; the
                sl = sl * mask_r           # true value is the zero pad.
            cols.append(sl)
    patch = jnp.concatenate(cols, axis=0)  # (KH*KW*C, Q) — in-VMEM patch view
    acc = jax.lax.dot_general(w_ref[...], patch,
                              (((1,), (0,)), ((), ())),
                              preferred_element_type=jnp.float32)   # (OC, Q)
    o_ref[0] = (acc + b_ref[...]).astype(o_ref.dtype)


def _vmem_budget_bytes():
    try:
        info = pltpu.get_tpu_info()
        return int(info.vmem_capacity_bytes) * 3 // 4
    except Exception:
        return 48 * 1024 * 1024            # conservative: v7x = 64 MiB physical


def spectral_norm_conv2d(x, w, b, u, *, padding=1, power_iterations=1):
    """x: (N,C,H,W) f32; w: (OC,C,KH,KW); b: (OC,); u: (OC,).

    Returns (y, u_new): y in NCHW, u_new the updated power-iteration vector
    (PyTorch SpectralNorm writes it back into the `weight_u` buffer).
    """
    assert power_iterations >= 1, "power_iterations must be >= 1"
    N, C, H, W = x.shape
    OC, IC, KH, KW = w.shape
    assert IC == C
    # The shifted-band trick is derived for the module's conv: 3x3, stride 1,
    # 'same' padding of 1.
    assert (KH, KW) == (3, 3) and padding == 1, "kernel assumes 3x3 / pad=1"
    # TODO(synk): generalize the shift offsets / edge masks to other (K, pad).

    HW = H * W
    CKK = C * KH * KW
    f32 = jnp.float32

    # Tap-major weight layout: column index = (dh*KW + dw)*C + c.  sigma and u
    # are invariant to this column permutation, so the power iteration runs on
    # it directly (matches torch's W.view(OC,-1) up to summation order).
    w_perm = jnp.transpose(w.astype(f32), (0, 2, 3, 1)).reshape(OC, CKK)
    u2 = u.reshape(1, OC).astype(f32)
    b2 = b.reshape(OC, 1).astype(f32)

    # ---- kernel 1: power iteration, emits u_new and the pre-scaled weight ----
    u_new, w_scaled = pl.pallas_call(
        functools.partial(_power_iter_kernel,
                          power_iterations=power_iterations),
        out_shape=(jax.ShapeDtypeStruct((1, OC), f32),
                   jax.ShapeDtypeStruct((OC, CKK), f32)),
        grid_spec=pltpu.PrefetchScalarGridSpec(
            num_scalar_prefetch=0,
            grid=(1,),
            in_specs=[pl.BlockSpec((OC, CKK), lambda i: (0, 0)),
                      pl.BlockSpec((1, OC), lambda i: (0, 0))],
            out_specs=(pl.BlockSpec((1, OC), lambda i: (0, 0)),
                       pl.BlockSpec((OC, CKK), lambda i: (0, 0)))),
        compiler_params=pltpu.CompilerParams(
            dimension_semantics=("arbitrary",)),
    )(w_perm, u2)

    # ---- input band: row-flattened x, front-padded by padding*W + padding ---
    # band[n, c, front + h*W + w] = x[n, c, h, w]; tap (dh, dw) of the conv is
    # the band shifted by dh*W + dw.  Only ~1x the input is written to HBM
    # (vs. the 9x materialized im2col this replaces).
    front = padding * W + padding                          # = W + 1
    L = pl.cdiv(HW + 2 * W + 2, 128) * 128                 # lane-aligned length
    band = jnp.pad(x.astype(f32).reshape(N, C, HW),
                   ((0, 0), (0, 0), (front, L - front - HW)))

    # Lane masks for the two width-wrap columns (see kernel docstring).
    col = jnp.arange(HW, dtype=jnp.int32) % W
    masks = jnp.stack([(col != 0).astype(f32),
                       (col != W - 1).astype(f32)], axis=0)          # (2, HW)

    # ---- VMEM budget check (v7x has half the VMEM of v5e/v6e) ---------------
    vmem_est = 4 * (2 * C * L + 2 * OC * HW              # double-buffered I/O
                    + OC * CKK + OC + 2 * HW             # resident w / b / masks
                    + (CKK + OC) * HW)                   # in-kernel patch + acc
    cparams = {"dimension_semantics": ("parallel",)}
    if vmem_est > (16 << 20):
        budget = _vmem_budget_bytes()
        if vmem_est > budget:
            # TODO(synk): for very large images, tile H into haloed row bands
            # (manual double-buffered DMA) instead of one band per batch elem.
            raise ValueError("flattened image band exceeds the VMEM budget; "
                             "H-band tiling not implemented")
        cparams["vmem_limit_bytes"] = int(min(budget, vmem_est + (8 << 20)))
    compiler_params = pltpu.CompilerParams(**cparams)

    # ---- kernel 2: conv-as-matmul over the resident band, grid over N -------
    # N >= 2 keeps the "parallel" axis feeding both v7x TensorCores.
    # TODO(synk): add OC / CKK grid tiling for realistic channel counts
    # (OC, C >= 64); at OC=8, CKK=36 the op is HBM-bound and a single resident
    # weight block is optimal.
    out_flat = pl.pallas_call(
        functools.partial(_conv_band_kernel, H=H, W=W, KH=KH, KW=KW),
        out_shape=jax.ShapeDtypeStruct((N, OC, HW), f32),
        grid_spec=pltpu.PrefetchScalarGridSpec(
            num_scalar_prefetch=0,
            grid=(N,),
            in_specs=[
                pl.BlockSpec((OC, CKK), lambda n: (0, 0)),     # weight (resident)
                pl.BlockSpec((OC, 1), lambda n: (0, 0)),       # bias
                pl.BlockSpec((2, HW), lambda n: (0, 0)),       # edge masks
                pl.BlockSpec((1, C, L), lambda n: (n, 0, 0)),  # input band
            ],
            out_specs=pl.BlockSpec((1, OC, HW), lambda n: (n, 0, 0))),
        compiler_params=compiler_params,
    )(w_scaled, b2, masks, band)

    # Free trailing-dim reshape — no post-kernel transpose.
    y = out_flat.reshape(N, OC, H, W)
    return y, u_new.reshape(OC)


def _reference(x, w, b, u, *, padding=1, power_iterations=1):
    """Pure-JAX reference (mirrors the PyTorch module)."""
    OC = w.shape[0]
    w_mat = w.reshape(OC, -1)
    uu = u
    v = None
    for _ in range(power_iterations):
        wv = w_mat.T @ uu
        v = wv / jnp.maximum(jnp.linalg.norm(wv), _EPS)
        wu = w_mat @ v
        uu = wu / jnp.maximum(jnp.linalg.norm(wu), _EPS)
    sigma = uu @ (w_mat @ v)
    w_sn = w / sigma
    y = jax.lax.conv_general_dilated(
        x, w_sn, window_strides=(1, 1),
        padding=[(padding, padding), (padding, padding)],
        dimension_numbers=("NCHW", "OIHW", "NCHW"))
    return y + b.reshape(1, OC, 1, 1), uu


if __name__ == "__main__":
    key = jax.random.PRNGKey(0)
    kx, kw, kb, ku = jax.random.split(key, 4)

    N, C, H, W = 2, 4, 16, 16
    OC, KH, KW = 8, 3, 3

    x = jax.random.normal(kx, (N, C, H, W), dtype=jnp.float32)
    w = jax.random.normal(kw, (OC, C, KH, KW), dtype=jnp.float32) * 0.1
    b = jax.random.normal(kb, (OC,), dtype=jnp.float32) * 0.01
    u0 = jax.random.normal(ku, (OC,), dtype=jnp.float32)
    u0 = u0 / jnp.maximum(jnp.linalg.norm(u0), _EPS)   # matches _make_params

    fn = jax.jit(spectral_norm_conv2d,
                 static_argnames=("padding", "power_iterations"))
    y, u_new = fn(x, w, b, u0, padding=1, power_iterations=1)
    y = jax.block_until_ready(y)

    y_ref, u_ref = _reference(x, w, b, u0, padding=1, power_iterations=1)
    assert y.shape == (N, OC, H, W)
    assert jnp.allclose(u_new, u_ref, atol=1e-4, rtol=1e-4), "u mismatch"
    assert jnp.allclose(y, y_ref, atol=1e-4, rtol=1e-4), "y mismatch vs reference"

    print("KERNEL_OK")
</pallas_src>

<mosaic_0001>
module attributes {stable_mosaic.version = 11 : i64} {
  func.func @_power_iter_kernel(%arg0: i32, %arg1: memref<8x36xf32, #tpu.memory_space<vmem>>, %arg2: memref<1x8xf32, #tpu.memory_space<vmem>>, %arg3: memref<1x8xf32, #tpu.memory_space<vmem>>, %arg4: memref<8x36xf32, #tpu.memory_space<vmem>>) attributes {dimension_semantics = [#tpu.dimension_semantics<arbitrary>], iteration_bounds = array<i64: 1>, scalar_prefetch = 0 : i64, scratch_operands = 0 : i64, tpu.core_type = #tpu.core_type<tc>, window_params = [{pipeline_mode = #tpu.pipeline_mode<synchronous>, transform_indices = @transform_0, window_bounds = array<i64: 8, 36>}, {pipeline_mode = #tpu.pipeline_mode<synchronous>, transform_indices = @transform_1, window_bounds = array<i64: 1, 8>}, {pipeline_mode = #tpu.pipeline_mode<synchronous>, transform_indices = @transform_2, window_bounds = array<i64: 1, 8>}, {pipeline_mode = #tpu.pipeline_mode<synchronous>, transform_indices = @transform_3, window_bounds = array<i64: 8, 36>}]} {
    %c0 = arith.constant 0 : index
    %c0_0 = arith.constant 0 : index
    %0 = vector.load %arg1[%c0, %c0_0] : memref<8x36xf32, #tpu.memory_space<vmem>>, vector<8x36xf32>
    %c0_1 = arith.constant 0 : index
    %c0_2 = arith.constant 0 : index
    %1 = vector.load %arg2[%c0_1, %c0_2] : memref<1x8xf32, #tpu.memory_space<vmem>>, vector<1x8xf32>
    %cst = arith.constant dense<0.000000e+00> : vector<1x36xf32>
    %2 = tpu.matmul %1, %0, %cst {dimension_numbers = #tpu.dot_dimension_numbers<[1], [0], [0], [1], [0, 0, 1, 1], [], []>} : vector<1x8xf32>, vector<8x36xf32>, vector<1x36xf32> -> vector<1x36xf32>
    %3 = arith.mulf %2, %2 : vector<1x36xf32>
    %4 = vector.shape_cast %3 : vector<1x36xf32> to vector<1x1x36xf32>
    %cst_3 = arith.constant dense<0.000000e+00> : vector<1xf32>
    %5 = vector.multi_reduction <add>, %4, %cst_3 [1, 2] : vector<1x1x36xf32> to vector<1xf32>
    %6 = vector.shape_cast %5 : vector<1xf32> to vector<1x1x1xf32>
    %7 = vector.extract %6[0, 0, 0] : f32 from vector<1x1x1xf32>
    %8 = math.sqrt %7 : f32
    %cst_4 = arith.constant 9.99999996E-13 : f32
    %9 = arith.maximumf %8, %cst_4 : f32
    %10 = vector.broadcast %9 : f32 to vector<1x36xf32>
    %11 = arith.divf %2, %10 : vector<1x36xf32>
    %cst_5 = arith.constant dense<0.000000e+00> : vector<1x8xf32>
    %12 = tpu.matmul %11, %0, %cst_5 {dimension_numbers = #tpu.dot_dimension_numbers<[1], [1], [0], [0], [0, 0, 1, 0], [], []>} : vector<1x36xf32>, vector<8x36xf32>, vector<1x8xf32> -> vector<1x8xf32>
    %13 = arith.mulf %12, %12 : vector<1x8xf32>
    %14 = vector.shape_cast %13 : vector<1x8xf32> to vector<1x1x8xf32>
    %cst_6 = arith.constant dense<0.000000e+00> : vector<1xf32>
    %15 = vector.multi_reduction <add>, %14, %cst_6 [1, 2] : vector<1x1x8xf32> to vector<1xf32>
    %16 = vector.shape_cast %15 : vector<1xf32> to vector<1x1x1xf32>
    %17 = vector.extract %16[0, 0, 0] : f32 from vector<1x1x1xf32>
    %18 = math.sqrt %17 : f32
    %cst_7 = arith.constant 9.99999996E-13 : f32
    %19 = arith.maximumf %18, %cst_7 : f32
    %20 = vector.broadcast %19 : f32 to vector<1x8xf32>
    %21 = arith.divf %12, %20 : vector<1x8xf32>
    %22 = arith.mulf %21, %12 : vector<1x8xf32>
    %23 = vector.shape_cast %22 : vector<1x8xf32> to vector<1x1x8xf32>
    %cst_8 = arith.constant dense<0.000000e+00> : vector<1xf32>
    %24 = vector.multi_reduction <add>, %23, %cst_8 [1, 2] : vector<1x1x8xf32> to vector<1xf32>
    %25 = vector.shape_cast %24 : vector<1xf32> to vector<1x1x1xf32>
    %26 = vector.extract %25[0, 0, 0] : f32 from vector<1x1x1xf32>
    %c0_9 = arith.constant 0 : index
    %c0_10 = arith.constant 0 : index
    %27 = vector.load %arg3[%c0_9, %c0_10] : memref<1x8xf32, #tpu.memory_space<vmem>>, vector<1x8xf32>
    tpu.vector_store %arg3[%c0_9, %c0_10], %21 {strides = array<i32>} : memref<1x8xf32, #tpu.memory_space<vmem>>, vector<1x8xf32>,
    %cst_11 = arith.constant 1.000000e+00 : f32
    %28 = arith.divf %cst_11, %26 : f32
    %29 = vector.broadcast %28 : f32 to vector<8x36xf32>
    %30 = arith.mulf %0, %29 : vector<8x36xf32>
    %c0_12 = arith.constant 0 : index
    %c0_13 = arith.constant 0 : index
    %31 = vector.load %arg4[%c0_12, %c0_13] : memref<8x36xf32, #tpu.memory_space<vmem>>, vector<8x36xf32>
    tpu.vector_store %arg4[%c0_12, %c0_13], %30 {strides = array<i32>} : memref<8x36xf32, #tpu.memory_space<vmem>>, vector<8x36xf32>,
    return
  }
  func.func @transform_0(%arg0: i32) -> (i32, i32) {
    %c0_i32 = arith.constant 0 : i32
    %c0_i32_0 = arith.constant 0 : i32
    %c0_i32_1 = arith.constant 0 : i32
    return %c0_i32, %c0_i32_0 : i32, i32
  }
  func.func @transform_1(%arg0: i32) -> (i32, i32) {
    %c0_i32 = arith.constant 0 : i32
    %c0_i32_0 = arith.constant 0 : i32
    %c0_i32_1 = arith.constant 0 : i32
    return %c0_i32, %c0_i32_0 : i32, i32
  }
  func.func @transform_2(%arg0: i32) -> (i32, i32) {
    %c0_i32 = arith.constant 0 : i32
    %c0_i32_0 = arith.constant 0 : i32
    %c0_i32_1 = arith.constant 0 : i32
    return %c0_i32, %c0_i32_0 : i32, i32
  }
  func.func @transform_3(%arg0: i32) -> (i32, i32) {
    %c0_i32 = arith.constant 0 : i32
    %c0_i32_0 = arith.constant 0 : i32
    %c0_i32_1 = arith.constant 0 : i32
    return %c0_i32, %c0_i32_0 : i32, i32
  }
}

module attributes {stable_mosaic.version = 11 : i64} {
  func.func @_conv_band_kernel(%arg0: i32, %arg1: memref<8x36xf32, #tpu.memory_space<vmem>>, %arg2: memref<8x1xf32, #tpu.memory_space<vmem>>, %arg3: memref<2x256xf32, #tpu.memory_space<vmem>>, %arg4: memref<1x4x384xf32, #tpu.memory_space<vmem>>, %arg5: memref<1x8x256xf32, #tpu.memory_space<vmem>>) attributes {dimension_semantics = [#tpu.dimension_semantics<parallel>], iteration_bounds = array<i64: 2>, scalar_prefetch = 0 : i64, scratch_operands = 0 : i64, tpu.core_type = #tpu.core_type<tc>, window_params = [{pipeline_mode = #tpu.pipeline_mode<synchronous>, transform_indices = @transform_0, window_bounds = array<i64: 8, 36>}, {pipeline_mode = #tpu.pipeline_mode<synchronous>, transform_indices = @transform_1, window_bounds = array<i64: 8, 1>}, {pipeline_mode = #tpu.pipeline_mode<synchronous>, transform_indices = @transform_2, window_bounds = array<i64: 2, 256>}, {transform_indices = @transform_3, window_bounds = array<i64: 1, 4, 384>}, {transform_indices = @transform_4, window_bounds = array<i64: 1, 8, 256>}]} {
    %c0 = arith.constant 0 : index
    %c0_0 = arith.constant 0 : index
    %c0_1 = arith.constant 0 : index
    %0 = vector.load %arg4[%c0, %c0_0, %c0_1] : memref<1x4x384xf32, #tpu.memory_space<vmem>>, vector<1x4x384xf32>
    %1 = vector.shape_cast %0 : vector<1x4x384xf32> to vector<4x384xf32>
    %c0_2 = arith.constant 0 : index
    %c0_3 = arith.constant 0 : index
    %2 = vector.load %arg3[%c0_2, %c0_3] : memref<2x256xf32, #tpu.memory_space<vmem>>, vector<1x256xf32>
    %c1 = arith.constant 1 : index
    %c0_4 = arith.constant 0 : index
    %3 = vector.load %arg3[%c1, %c0_4] : memref<2x256xf32, #tpu.memory_space<vmem>>, vector<1x256xf32>
    %4 = vector.extract_strided_slice %1 {offsets = [0, 0], sizes = [4, 256], strides = [1, 1]} : vector<4x384xf32> to vector<4x256xf32>
    %5 = vector.broadcast %2 : vector<1x256xf32> to vector<4x256xf32>
    %6 = arith.mulf %4, %5 : vector<4x256xf32>
    %7 = vector.extract_strided_slice %1 {offsets = [0, 1], sizes = [4, 256], strides = [1, 1]} : vector<4x384xf32> to vector<4x256xf32>
    %8 = vector.extract_strided_slice %1 {offsets = [0, 2], sizes = [4, 256], strides = [1, 1]} : vector<4x384xf32> to vector<4x256xf32>
    %9 = vector.broadcast %3 : vector<1x256xf32> to vector<4x256xf32>
    %10 = arith.mulf %8, %9 : vector<4x256xf32>
    %11 = vector.extract_strided_slice %1 {offsets = [0, 16], sizes = [4, 256], strides = [1, 1]} : vector<4x384xf32> to vector<4x256xf32>
    %12 = vector.broadcast %2 : vector<1x256xf32> to vector<4x256xf32>
    %13 = arith.mulf %11, %12 : vector<4x256xf32>
    %14 = vector.extract_strided_slice %1 {offsets = [0, 17], sizes = [4, 256], strides = [1, 1]} : vector<4x384xf32> to vector<4x256xf32>
    %15 = vector.extract_strided_slice %1 {offsets = [0, 18], sizes = [4, 256], strides = [1, 1]} : vector<4x384xf32> to vector<4x256xf32>
    %16 = vector.broadcast %3 : vector<1x256xf32> to vector<4x256xf32>
    %17 = arith.mulf %15, %16 : vector<4x256xf32>
    %18 = vector.extract_strided_slice %1 {offsets = [0, 32], sizes = [4, 256], strides = [1, 1]} : vector<4x384xf32> to vector<4x256xf32>
    %19 = vector.broadcast %2 : vector<1x256xf32> to vector<4x256xf32>
    %20 = arith.mulf %18, %19 : vector<4x256xf32>
    %21 = vector.extract_strided_slice %1 {offsets = [0, 33], sizes = [4, 256], strides = [1, 1]} : vector<4x384xf32> to vector<4x256xf32>
    %22 = vector.extract_strided_slice %1 {offsets = [0, 34], sizes = [4, 256], strides = [1, 1]} : vector<4x384xf32> to vector<4x256xf32>
    %23 = vector.broadcast %3 : vector<1x256xf32> to vector<4x256xf32>
    %24 = arith.mulf %22, %23 : vector<4x256xf32>
    %25 = tpu.concatenate %6, %7, %10, %13, %14, %17, %20, %21, %24 in 0 : vector<4x256xf32>, vector<4x256xf32>, vector<4x256xf32>, vector<4x256xf32>, vector<4x256xf32>, vector<4x256xf32>, vector<4x256xf32>, vector<4x256xf32>, vector<4x256xf32> -> vector<36x256xf32>
    %c0_5 = arith.constant 0 : index
    %c0_6 = arith.constant 0 : index
    %26 = vector.load %arg1[%c0_5, %c0_6] : memref<8x36xf32, #tpu.memory_space<vmem>>, vector<8x36xf32>
    %cst = arith.constant dense<0.000000e+00> : vector<8x256xf32>
    %27 = tpu.matmul %26, %25, %cst {dimension_numbers = #tpu.dot_dimension_numbers<[1], [0], [0], [1], [0, 0, 1, 1], [], []>} : vector<8x36xf32>, vector<36x256xf32>, vector<8x256xf32> -> vector<8x256xf32>
    %c0_7 = arith.constant 0 : index
    %c0_8 = arith.constant 0 : index
    %28 = vector.load %arg2[%c0_7, %c0_8] : memref<8x1xf32, #tpu.memory_space<vmem>>, vector<8x1xf32>
    %29 = vector.broadcast %28 : vector<8x1xf32> to vector<8x256xf32>
    %30 = arith.addf %27, %29 : vector<8x256xf32>
    %c0_9 = arith.constant 0 : index
    %c0_10 = arith.constant 0 : index
    %c0_11 = arith.constant 0 : index
    %31 = vector.load %arg5[%c0_9, %c0_10, %c0_11] : memref<1x8x256xf32, #tpu.memory_space<vmem>>, vector<1x8x256xf32>
    %32 = vector.shape_cast %31 : vector<1x8x256xf32> to vector<8x256xf32>
    %33 = vector.shape_cast %30 : vector<8x256xf32> to vector<1x8x256xf32>
    tpu.vector_store %arg5[%c0_9, %c0_10, %c0_11], %33 {strides = array<i32>} : memref<1x8x256xf32, #tpu.memory_space<vmem>>, vector<1x8x256xf32>,
    return
  }
  func.func @transform_0(%arg0: i32) -> (i32, i32) {
    %c0_i32 = arith.constant 0 : i32
    %c0_i32_0 = arith.constant 0 : i32
    %c0_i32_1 = arith.constant 0 : i32
    return %c0_i32, %c0_i32_0 : i32, i32
  }
  func.func @transform_1(%arg0: i32) -> (i32, i32) {
    %c0_i32 = arith.constant 0 : i32
    %c0_i32_0 = arith.constant 0 : i32
    %c0_i32_1 = arith.constant 0 : i32
    return %c0_i32, %c0_i32_0 : i32, i32
  }
  func.func @transform_2(%arg0: i32) -> (i32, i32) {
    %c0_i32 = arith.constant 0 : i32
    %c0_i32_0 = arith.constant 0 : i32
    %c0_i32_1 = arith.constant 0 : i32
    return %c0_i32, %c0_i32_0 : i32, i32
  }
  func.func @transform_3(%arg0: i32) -> (i32, i32, i32) {
    %c0_i32 = arith.constant 0 : i32
    %c0_i32_0 = arith.constant 0 : i32
    %c0_i32_1 = arith.constant 0 : i32
    return %arg0, %c0_i32, %c0_i32_0 : i32, i32, i32
  }
  func.func @transform_4(%arg0: i32) -> (i32, i32, i32) {
    %c0_i32 = arith.constant 0 : i32
    %c0_i32_0 = arith.constant 0 : i32
    %c0_i32_1 = arith.constant 0 : i32
    return %arg0, %c0_i32, %c0_i32_0 : i32, i32, i32
  }
}

</mosaic_0001>

<bundles_post_ra>
// kernel: spectral_norm_conv2d.2
= control target key start
LH: loop header
LB: loop body
LE: loop exit
PB: predicated region body
PF: predicated region fallthrough
CT: control target
= control target key end

     0   :  { %vm16_vm0 = vcmask 64512   ;;  %s304_s0 = inlined_call_operand.vmem [shape: f32[8,36], index: 0, kind: input, shape index: {}]   ;;  %s305_s1 = inlined_call_operand.vmem [shape: f32[1,8], index: 1, kind: input, shape index: {}]   ;;  %s306_s2 = inlined_call_operand.hbm [shape: f32[1,8], index: 2, kind: output, shape index: {0}]   ;;  %s307_s3 = inlined_call_operand.vmem [shape: f32[8,36], index: 3, kind: output, shape index: {1}]  }
   0x1   :  { %v282_v0 = vld [vmem:[%s304_s0] sm:$0xff] }
   0x2   :  { %v15_v1 = vld [vmem:[%s305_s1] sm:$0x1] }
   0x3   :  { %9 = vsyncpa [#allocation3], 0  ;;  %35 = vmatpush.msra.mxu0 %v282_v0  ;;  %vm41_vm1 = vcmask 286720   ;;  %vm83_vm4 = vcmask 293888   ;;  %s257_s16 = smov 1e-12  }
   0x4   :  { %204 = vmatmul.msk.f32.vlgmr.msra.gmra.mxu0 %vm16_vm0, %v15_v1  ;;  %205 = vmatpush.xpose.msk.msra.mxu1 %vm83_vm4, %v282_v0  ;;  %vm111_vm9 = vcmask 57344   ;;  %s258_s21 = smov [#allocation2]   ;;  %s191_s25 = sshll.u32 %s306_s2, 4  ;;  %s192_s25 = int_to_ptr.hbm [resolvable:$true] %s191_s25 }
   0x5   :  { %s189_s22 = sshll.u32 %s258_s21, 4  ;;  %s190_s22 = int_to_ptr.vmem [resolvable:$true] %s189_s22 }
  0x81   :  { %v37_v2 = vpop.f32.mrf.mxu0 }
  0x82   :  { %v40_v3 = vmul.f32 %v37_v2, %v37_v2 }
  0x84   :  { %v42_v4 = vsel %vm41_vm1, %v40_v3, 0.0 }
  0x85   :  { %43 = vadd.xlane.f32.xlu0 %v42_v4 }
  0xf8   :  { %v44_v5 = vpop.xlane.xlu0 %43 }
  0xf9   :  { %v45_v6 = vrot.slane %v44_v5, 4 }
  0xfb   :  { %v46_v7 = vadd.f32 %v45_v6, %v44_v5 }
  0xfd   :  { %v47_v8 = vrot.slane %v46_v7, 2 }
  0xff   :  { %v48_v9 = vadd.f32 %v47_v8, %v46_v7 }
 0x101   :  { %v49_v10 = vrot.slane %v48_v9, 1 }
 0x103   :  { %v50_v11 = vadd.f32 %v49_v10, %v48_v9 }
 0x105   :  { %207 = vpush %v50_v11 }
 0x136   :  { %s208_s0 = spop %207 }
 0x137   :  { %v52_v12 = vstv %s208_s0 }
 0x138   :  { %221 = vrsqrt.f32 %v52_v12  ;;  %vm60_vm2 = vcmp.eq.f32.partialorder %v52_v12, inf  ;;  %v63_v20 = vand.u32 2147483648, %v52_v12  ;;  %vm62_vm3 = vcmp.eq.f32.partialorder %v52_v12, 0.0 }
 0x13e   :  { %v222_v13 = vpop.eup %221 }
 0x13f   :  { %v54_v14 = vmul.f32 %v222_v13, %v52_v12 }
 0x141   :  { %v55_v15 = vmul.f32 %v222_v13, %v54_v14 }
 0x143   :  { %v56_v16 = vmul.f32 0.5, %v55_v15 }
 0x145   :  { %v57_v17 = vsub.f32 1.5, %v56_v16 }
 0x147   :  { %v58_v18 = vmul.f32 %v222_v13, %v57_v17 }
 0x149   :  { %v59_v19 = vmul.f32 %v58_v18, %v52_v12 }
 0x14b   :  { %v61_v21 = vsel %vm60_vm2, %v52_v12, %v59_v19 }
 0x14c   :  { %v64_v22 = vsel %vm62_vm3, %v63_v20, %v61_v21 }
 0x14d   :  { %209 = vpush %v64_v22 }
 0x17e   :  { %s210_s1 = spop %209 }
 0x17f   :  { %s66_s17 = smax.f32 %s257_s16, %s210_s1 }
 0x180   :  { %v67_v23 = vstv %s66_s17 }
 0x181   :  { %223 = vrcp.f32 %v67_v23  ;;  %v79_v27 = vand.u32 2147483648, %v67_v23  ;;  %v77_v29 = vand.u32 2147483647, %v67_v23  ;;  %vm73_vm6 = vweird.f32 %v67_v23 }
 0x183   :  { %v80_v31 = vor.u32 1.1754944e-38, %v79_v27  ;;  %vm78_vm8 = vcmp.eq.f32.partialorder %v77_v29, 8.507059e+37 }
 0x187   :  { %v224_v24 = vpop.eup %223 }
 0x188   :  { %v69_v25 = vmul.f32 %v224_v24, %v67_v23  ;;  %vm74_vm5 = vweird.f32 %v224_v24 }
 0x189   :  { %vm75_vm7 = vmor %vm73_vm6, %vm74_vm5 }
 0x18a   :  { %v70_v26 = vsub.f32 1.0, %v69_v25 }
 0x18c   :  { %v71_v28 = vmul.f32 %v224_v24, %v70_v26 }
 0x18e   :  { %v72_v30 = vadd.f32 %v224_v24, %v71_v28 }
 0x190   :  { %v76_v32 = vsel %vm75_vm7, %v224_v24, %v72_v30 }
 0x191   :  { %v81_v33 = vsel %vm78_vm8, %v80_v31, %v76_v32 }
 0x192   :  { %v82_v34 = vmul.f32 %v81_v33, %v37_v2 }
 0x194   :  { %206 = vmatmul.msk.f32.vlgmr.msra.gmra.mxu1 %vm83_vm4, %v82_v34 }
 0x211   :  { %v107_v35 = vpop.f32.mrf.mxu1 }
 0x212   :  { %v110_v36 = vmul.f32 %v107_v35, %v107_v35 }
 0x214   :  { %v112_v37 = vsel %vm111_vm9, %v110_v36, 0.0 }
 0x215   :  { %113 = vadd.xlane.f32.xlu0 %v112_v37 }
 0x288   :  { %v114_v38 = vpop.xlane.xlu0 %113 }
 0x289   :  { %v115_v39 = vrot.slane %v114_v38, 4 }
 0x28b   :  { %v116_v40 = vadd.f32 %v115_v39, %v114_v38 }
 0x28d   :  { %v117_v41 = vrot.slane %v116_v40, 2 }
 0x28f   :  { %v118_v42 = vadd.f32 %v117_v41, %v116_v40 }
 0x291   :  { %v119_v43 = vrot.slane %v118_v42, 1 }
 0x293   :  { %v120_v44 = vadd.f32 %v119_v43, %v118_v42 }
 0x295   :  { %211 = vpush %v120_v44 }
 0x2c6   :  { %s212_s18 = spop %211 }
 0x2c7   :  { %v122_v45 = vstv %s212_s18 }
 0x2c8   :  { %225 = vrsqrt.f32 %v122_v45  ;;  %vm130_vm10 = vcmp.eq.f32.partialorder %v122_v45, inf  ;;  %v133_v53 = vand.u32 2147483648, %v122_v45  ;;  %vm132_vm11 = vcmp.eq.f32.partialorder %v122_v45, 0.0 }
 0x2ce   :  { %v226_v46 = vpop.eup %225 }
 0x2cf   :  { %v124_v47 = vmul.f32 %v226_v46, %v122_v45 }
 0x2d1   :  { %v125_v48 = vmul.f32 %v226_v46, %v124_v47 }
 0x2d3   :  { %v126_v49 = vmul.f32 0.5, %v125_v48 }
 0x2d5   :  { %v127_v50 = vsub.f32 1.5, %v126_v49 }
 0x2d7   :  { %v128_v51 = vmul.f32 %v226_v46, %v127_v50 }
 0x2d9   :  { %v129_v52 = vmul.f32 %v128_v51, %v122_v45 }
 0x2db   :  { %v131_v54 = vsel %vm130_vm10, %v122_v45, %v129_v52 }
 0x2dc   :  { %v134_v55 = vsel %vm132_vm11, %v133_v53, %v131_v54 }
 0x2dd   :  { %213 = vpush %v134_v55 }
 0x30e   :  { %s214_s19 = spop %213 }
 0x30f   :  { %s136_s20 = smax.f32 %s257_s16, %s214_s19 }
 0x310   :  { %v137_v56 = vstv %s136_s20 }
 0x311   :  { %227 = vrcp.f32 %v137_v56  ;;  %v149_v60 = vand.u32 2147483648, %v137_v56  ;;  %v147_v62 = vand.u32 2147483647, %v137_v56  ;;  %vm143_vm13 = vweird.f32 %v137_v56 }
 0x313   :  { %v150_v1 = vor.u32 1.1754944e-38, %v149_v60  ;;  %vm148_vm15 = vcmp.eq.f32.partialorder %v147_v62, 8.507059e+37 }
 0x317   :  { %v228_v57 = vpop.eup %227 }
 0x318   :  { %v139_v58 = vmul.f32 %v228_v57, %v137_v56  ;;  %vm144_vm12 = vweird.f32 %v228_v57 }
 0x319   :  { %vm145_vm14 = vmor %vm143_vm13, %vm144_vm12 }
 0x31a   :  { %v140_v59 = vsub.f32 1.0, %v139_v58 }
 0x31c   :  { %v141_v61 = vmul.f32 %v228_v57, %v140_v59 }
 0x31e   :  { %v142_v63 = vadd.f32 %v228_v57, %v141_v61 }
 0x320   :  { %v146_v2 = vsel %vm145_vm14, %v228_v57, %v142_v63 }
 0x321   :  { %v151_v3 = vsel %vm148_vm15, %v150_v1, %v146_v2 }
 0x322   :  { %v152_v4 = vmul.f32 %v151_v3, %v107_v35 }
 0x324   :  { %v153_v5 = vmul.f32 %v152_v4, %v107_v35  ;;  %164 = vst.msk [vmem:[#allocation2] sm:$0x1] %vm111_vm9, %v152_v4 }
 0x325   :  { %194 = dma.vmem_to_hbm [thread:$0]  %s190_s22, 16, %s192_s25, [#allocation3]  }
 0x326   :  { %v154_v6 = vsel %vm111_vm9, %v153_v5, 0.0 }
 0x327   :  { %155 = vadd.xlane.f32.xlu1 %v154_v6 }
 0x39a   :  { %v156_v7 = vpop.xlane.xlu1 %155 }
 0x39b   :  { %v157_v8 = vrot.slane %v156_v7, 4 }
 0x39d   :  { %v158_v9 = vadd.f32 %v157_v8, %v156_v7 }
 0x39f   :  { %v159_v10 = vrot.slane %v158_v9, 2 }
 0x3a1   :  { %v160_v11 = vadd.f32 %v159_v10, %v158_v9 }
 0x3a3   :  { %v161_v12 = vrot.slane %v160_v11, 1 }
 0x3a5   :  { %v162_v13 = vadd.f32 %v161_v12, %v160_v11 }
 0x3a7   :  { %215 = vpush %v162_v13 }
 0x3d8   :  { %s216_s26 = spop %215 }
 0x3d9   :  { %v165_v14 = vstv %s216_s26 }
 0x3da   :  { %229 = vrcp.f32 %v165_v14  ;;  %v177_v18 = vand.u32 2147483648, %v165_v14  ;;  %v175_v20 = vand.u32 2147483647, %v165_v14  ;;  %vm171_vm1 = vweird.f32 %v165_v14 }
 0x3dc   :  { %v178_v22 = vor.u32 1.1754944e-38, %v177_v18  ;;  %vm176_vm3 = vcmp.eq.f32.partialorder %v175_v20, 8.507059e+37 }
 0x3e0   :  { %v230_v15 = vpop.eup %229 }
 0x3e1   :  { %v167_v16 = vmul.f32 %v230_v15, %v165_v14  ;;  %vm172_vm0 = vweird.f32 %v230_v15 }
 0x3e2   :  { %vm173_vm2 = vmor %vm171_vm1, %vm172_vm0 }
 0x3e3   :  { %v168_v17 = vsub.f32 1.0, %v167_v16 }
 0x3e5   :  { %v169_v19 = vmul.f32 %v230_v15, %v168_v17 }
 0x3e7   :  { %v170_v21 = vadd.f32 %v230_v15, %v169_v19 }
 0x3e9   :  { %v174_v23 = vsel %vm173_vm2, %v230_v15, %v170_v21 }
 0x3ea   :  { %v179_v24 = vsel %vm176_vm3, %v178_v22, %v174_v23 }
 0x3eb   :  { %217 = vpush %v179_v24 }
 0x41c   :  { %s218_s2 = spop %217 }
 0x41d   :  { %v181_v25 = vstv %s218_s2 }
 0x41e   :  { %v182_v26 = vmul.f32 %v181_v25, %v282_v0 }
 0x420   :  { %183 = vst.msk [vmem:[%s307_s3] sm:$0xff] %vm83_vm4, %v182_v26 }
 0x421   :  { %255 = dma.done.wait [#allocation3], 16  }
 0x422   :  { %256 = vsyncadd [#allocation3], 4294967280 }
 0x423   :  { %203 = vsyncpa [#allocation3], 1 }

// kernel: spectral_norm_conv2d.3
= control target key start
LH: loop header
LB: loop body
LE: loop exit
PB: predicated region body
PF: predicated region fallthrough
CT: control target
= control target key end

     0   :  { %s660_s15 = smov 0   ;;  %s773_s0 = inlined_call_operand.vmem [shape: f32[8,36], index: 0, kind: input, shape index: {}]   ;;  %s774_s1 = inlined_call_operand.vmem [shape: f32[8,1], index: 1, kind: input, shape index: {}]   ;;  %s775_s2 = inlined_call_operand.vmem [shape: f32[2,256], index: 2, kind: input, shape index: {}]   ;;  %s776_s3 = inlined_call_operand.vmem [shape: f32[2,4,384], index: 3, kind: input, shape index: {}]   ;;  %s777_s4 = inlined_call_operand.vmem [shape: f32[2,8,256], index: 4, kind: output, shape index: {}]  }
   0x1 LB: > { %s537_s16 = sadd.s32 4294967295, %s619_s15   ;;  %p541_p0 = scmp.ge.s32.totalorder %s619_s15, 1  ;;  %s619_s15 = sphi %s660_s15, %s14_s15  }
   0x2   : > { %p162_p1 = scmp.lt.s32.totalorder %s619_s15, 3 }
   0x4   : > { %p163_p2 = pnand %p541_p0, %p162_p1 }
   0x5   : > { %p188_p3 = scmp.lt.s32.totalorder (!%p163_p2), %s537_s16, 1  ;;  %s621_s22 = smov (!%p163_p2), 2  }
   0x6   : > { %166 = sbr.rel (%p163_p2) target bundleno = 453 (0x1c5), region = 36  ;;  %s622_s23 = smov (!%p163_p2), 18  }
   0x7   : > { %s623_s27 = smov (!%p163_p2), 34   ;;  %s624_s28 = smov (!%p163_p2), 16  }
   0x8   : > { %s625_s29 = smov (!%p163_p2), 32   ;;  %s626_s30 = smov (!%p163_p2), 126  }
   0x9   : > { %s627_s5 = smov (!%p163_p2), 112   ;;  %s628_s6 = smov (!%p163_p2), 111  }
   0xa   : > { %s629_s7 = smov (!%p163_p2), 110   ;;  %s630_s8 = smov (!%p163_p2), 96  }
   0xb   : > { %v545_v0 = vld [vmem:[%s775_s2 + $0x1] ss:$2 sm:$0x3]  ;;  %v200_v3 = vld [vmem:[%s775_s2] ss:$2 sm:$0x3] }
   0xc   : > { %v212_v1 = vperm.slane %v545_v0, 0  ;;  %v213_v2 = vperm.slane %v545_v0, 1  ;;  %vm207_vm0 = vcmask 1043456   ;;  %v205_v4 = vperm.slane %v200_v3, 1  ;;  %s779_s16 = smov (!%p188_p3, %s537_s16), 1  ;;  %s631_s9 = smov 95  }
   0xd   : > { %v204_v6 = vperm.slane %v200_v3, 0  ;;  %s553_s21 = smul.u32 12, %s779_s16  ;;  %vm219_vm1 = vcmask 15360   ;;  %vm228_vm2 = vcmask 130048   ;;  %vm237_vm3 = vcmask 146432   ;;  %s632_s10 = smov 94  }
   0xe   : > { %v214_v5 = vrot.slane %v213_v2, 4  ;;  %v206_v7 = vrot.slane %v205_v4, 4  ;;  %vm246_vm4 = vcmask 261120   ;;  %vm255_vm5 = vcmask 277504   ;;  %s633_s11 = smov 127   ;;  %s552_s18 = sshll.u32 %s779_s16, 4 }
   0xf   : > { %s192_s26 = scalar_lea.vmem %s776_s3, %s553_s21  ;;  %vm358_vm6 = vcmask 900096   ;;  %vm377_vm7 = vcmask 785408   ;;  %vm395_vm8 = vcmask 777216   ;;  %vm338_vm9 = vcmask 908288   ;;  %s197_s21 = scalar_lea.vmem %s777_s4, %s552_s18 }
  0x10   : > { %v215_v8 = vsel %vm207_vm0, %v212_v1, %v214_v5  ;;  %v208_v9 = vsel %vm207_vm0, %v204_v6, %v206_v7  ;;  %v682_v10 = vld [vmem:[%s192_s26] sm:$0xff]  ;;  %v690_v14 = vld [vmem:[%s192_s26 + $0x8] sm:$0xf]  ;;  %vm414_vm10 = vcmask 769024   ;;  %vm321_vm11 = vcmask 916480  }
  0x11   : > { %216 = vrot.lane.b32.xlu0 %v215_v8, %s621_s22  ;;  %234 = vrot.lane.b32.xlu1 %v215_v8, %s622_s23  ;;  %v210_v11 = vmul.f32 %v208_v9, %v682_v10  ;;  %272 = vst [vmem:[#allocation1 + $0x11] ss:$2 sm:$0xff] %v690_v14  ;;  %vm301_vm12 = vcmask 1031168   ;;  %vm282_vm13 = vcmask 1039360   ;;  %vm432_vm14 = vcmask 293888  }
  0x12   : > { %252 = vrot.lane.b32.xlu2 %v215_v8, %s623_s27 }
  0x13   : > { %262 = vst [vmem:[#allocation1] ss:$2 sm:$0xff] %v210_v11 }
  0x18   : > { %v693_v17 = vld.sshfl [vmem:[#allocation1 + $0x10] sm:$0xff pattern:$0x75316420] }
  0x19   : > { %225 = vrot.lane.b32.xlu0 %v208_v9, %s624_s28  ;;  %243 = vrot.lane.b32.xlu1 %v208_v9, %s625_s29 }
  0x1a   : > { %v685_v12 = vld.sshfl [vmem:[#allocation1] sm:$0xff pattern:$0x75316420]  ;;  %v687_v13 = vld.sshfl [vmem:[#allocation1 + $0x8] sm:$0xff pattern:$0x75316420] }
  0x1b   : > { %270 = vst [vmem:[#allocation1 + $0x1] ss:$2 sm:$0xff] %v682_v10 }
  0x22   : > { %v695_v18 = vld.sshfl [vmem:[#allocation1] sm:$0xff pattern:$0x75316420]  ;;  %v697_v19 = vld.sshfl [vmem:[#allocation1 + $0x8] sm:$0xff pattern:$0x75316420] }
  0x23   : > { %v606_v55 = vpack.i.bf16 %v697_v19, %v695_v18  ;;  %v426_v18 = vld [vmem:[%s774_s1] sm:$0xff] }
  0x6c   : > { %v253_v54 = vpop.permute.xlu2 %252 }
  0x6d   : > { %v254_v56 = vrot.slane %v253_v54, 4 }
  0x6f   : > { %v256_v61 = vsel %vm255_vm5, %v254_v56, %v253_v54  ;;  %v260_v62 = vmul.f32 %v254_v56, %v690_v14 }
  0x70   : > { %v259_v63 = vmul.f32 %v256_v61, %v682_v10 }
  0x83   : > { %v217_v15 = vpop.permute.xlu0 %216  ;;  %v235_v32 = vpop.permute.xlu1 %234 }
  0x84   : > { %v218_v16 = vrot.slane %v217_v15, 4  ;;  %v236_v34 = vrot.slane %v235_v32, 4 }
  0x86   : > { %v220_v20 = vsel %vm219_vm1, %v218_v16, %v217_v15  ;;  %v224_v21 = vmul.f32 %v218_v16, %v690_v14  ;;  %v242_v38 = vmul.f32 %v236_v34, %v690_v14  ;;  %v238_v39 = vsel %vm237_vm3, %v236_v34, %v235_v32 }
  0x87   : > { %v223_v22 = vmul.f32 %v220_v20, %v682_v10  ;;  %v241_v42 = vmul.f32 %v238_v39, %v682_v10 }
  0x88   : > { %291 = vst [vmem:[#allocation1 + $0x10] ss:$2 sm:$0xff] %v224_v21 }
  0x89   : > { %289 = vst [vmem:[#allocation1] ss:$2 sm:$0xff] %v223_v22 }
  0x8b   : > { %v226_v23 = vpop.permute.xlu0 %225  ;;  %v244_v40 = vpop.permute.xlu1 %243 }
  0x8c   : > { %v227_v24 = vrot.slane %v226_v23, 4  ;;  %v245_v43 = vrot.slane %v244_v40, 4 }
  0x8e   : > { %v229_v25 = vsel %vm228_vm2, %v227_v24, %v226_v23  ;;  %v233_v26 = vmul.f32 %v227_v24, %v690_v14  ;;  %v251_v47 = vmul.f32 %v245_v43, %v690_v14  ;;  %v247_v48 = vsel %vm246_vm4, %v245_v43, %v244_v40 }
  0x8f   : > { %v232_v27 = vmul.f32 %v229_v25, %v682_v10  ;;  %v294_v28 = vld.sshfl [vmem:[#allocation1 + $0x10] sm:$0xff pattern:$0x75316420]  ;;  %v250_v50 = vmul.f32 %v247_v48, %v682_v10 }
  0x90   : > { %311 = vst [vmem:[#allocation1 + $0x11] ss:$2 sm:$0xff] %v233_v26  ;;  %299 = vrot.lane.b32.xlu2 %v294_v28, %s626_s30  ;;  %v292_v29 = vld.sshfl [vmem:[#allocation1] sm:$0xff pattern:$0x75316420] }
  0x91   : > { %v293_v30 = vld.sshfl [vmem:[#allocation1 + $0x8] sm:$0xff pattern:$0x75316420] }
  0x92   : > { %v576_v31 = vpack.i.bf16 %v293_v30, %v292_v29  ;;  %309 = vst [vmem:[#allocation1 + $0x1] ss:$2 sm:$0xff] %v232_v27 }
  0x94   : > { %577 = vrot.lane.b32.xlu1 %v576_v31, %s626_s30 }
  0x97   : > { %v703_v33 = vld.sshfl [vmem:[#allocation1 + $0x10] sm:$0xff pattern:$0x75316420] }
  0x98   : > { %328 = vst [vmem:[#allocation1 + $0x10] ss:$2 sm:$0xff] %v690_v14 }
  0x99   : > { %v312_v35 = vld.sshfl [vmem:[#allocation1] sm:$0xff pattern:$0x75316420]  ;;  %v313_v36 = vld.sshfl [vmem:[#allocation1 + $0x8] sm:$0xff pattern:$0x75316420] }
  0x9a   : > { %v581_v37 = vpack.i.bf16 %v313_v36, %v312_v35  ;;  %326 = vst [vmem:[#allocation1] ss:$2 sm:$0xff] %v682_v10 }
  0x9c   : > { %582 = vrot.lane.b32.xlu0 %v581_v37, %s627_s5 }
  0x9f   : > { %v331_v41 = vld.sshfl [vmem:[#allocation1 + $0x10] sm:$0xff pattern:$0x75316420] }
  0xa0   : > { %348 = vst [vmem:[#allocation1 + $0x11] ss:$2 sm:$0xff] %v242_v38  ;;  %336 = vrot.lane.b32.xlu1 %v331_v41, %s628_s6 }
  0xa1   : > { %v329_v44 = vld.sshfl [vmem:[#allocation1] sm:$0xff pattern:$0x75316420]  ;;  %v330_v45 = vld.sshfl [vmem:[#allocation1 + $0x8] sm:$0xff pattern:$0x75316420] }
  0xa2   : > { %v586_v46 = vpack.i.bf16 %v330_v45, %v329_v44  ;;  %346 = vst [vmem:[#allocation1 + $0x1] ss:$2 sm:$0xff] %v241_v42 }
  0xa4   : > { %587 = vrot.lane.b32.xlu0 %v586_v46, %s628_s6 }
  0xa7   : > { %v351_v49 = vld.sshfl [vmem:[#allocation1 + $0x10] sm:$0xff pattern:$0x75316420] }
  0xa8   : > { %367 = vst [vmem:[#allocation1 + $0x10] ss:$2 sm:$0xff] %v251_v47 }
  0xa9   : > { %v349_v51 = vld.sshfl [vmem:[#allocation1] sm:$0xff pattern:$0x75316420]  ;;  %v350_v52 = vld.sshfl [vmem:[#allocation1 + $0x8] sm:$0xff pattern:$0x75316420] }
  0xaa   : > { %v591_v53 = vpack.i.bf16 %v350_v52, %v349_v51  ;;  %365 = vst [vmem:[#allocation1] ss:$2 sm:$0xff] %v250_v50 }
  0xac   : > { %356 = vrot.lane.b32.xlu0 %v351_v49, %s629_s7  ;;  %592 = vrot.lane.b32.xlu2 %v591_v53, %s629_s7 }
  0xaf   : > { %v370_v57 = vld.sshfl [vmem:[#allocation1 + $0x10] sm:$0xff pattern:$0x75316420] }
  0xb0   : > { %385 = vst [vmem:[#allocation1 + $0x11] ss:$2 sm:$0xff] %v690_v14 }
  0xb1   : > { %v368_v58 = vld.sshfl [vmem:[#allocation1] sm:$0xff pattern:$0x75316420]  ;;  %v369_v59 = vld.sshfl [vmem:[#allocation1 + $0x8] sm:$0xff pattern:$0x75316420] }
  0xb2   : > { %v596_v60 = vpack.i.bf16 %v369_v59, %v368_v58  ;;  %383 = vst [vmem:[#allocation1 + $0x1] ss:$2 sm:$0xff] %v682_v10 }
  0xb4   : > { %375 = vrot.lane.b32.xlu0 %v370_v57, %s630_s8  ;;  %597 = vrot.lane.b32.xlu2 %v596_v60, %s630_s8  ;;  %v425_v60 = vld [vmem:[%s773_s0] sm:$0xff] }
  0xb7   : > { %v388_v0 = vld.sshfl [vmem:[#allocation1 + $0x10] sm:$0xff pattern:$0x75316420] }
  0xb8   : > { %404 = vst [vmem:[#allocation1 + $0x10] ss:$2 sm:$0xff] %v260_v62 }
  0xb9   : > { %v386_v1 = vld.sshfl [vmem:[#allocation1] sm:$0xff pattern:$0x75316420]  ;;  %v387_v2 = vld.sshfl [vmem:[#allocation1 + $0x8] sm:$0xff pattern:$0x75316420] }
  0xba   : > { %v601_v3 = vpack.i.bf16 %v387_v2, %v386_v1  ;;  %402 = vst [vmem:[#allocation1] ss:$2 sm:$0xff] %v259_v63 }
  0xbc   : > { %393 = vrot.lane.b32.xlu2 %v388_v0, %s631_s9  ;;  %602 = vrot.lane.b32.xlu1 %v601_v3, %s631_s9 }
  0xbf   : > { %v407_v4 = vld.sshfl [vmem:[#allocation1 + $0x10] sm:$0xff pattern:$0x75316420] }
  0xc1   : > { %v406_v5 = vld.sshfl [vmem:[#allocation1 + $0x8] sm:$0xff pattern:$0x75316420]  ;;  %v405_v6 = vld.sshfl [vmem:[#allocation1] sm:$0xff pattern:$0x75316420] }
  0xc2   : > { %410 = vrot.lane.b32.xlu0 %v406_v5, %s632_s10 }
  0xc4   : > { %412 = vrot.lane.b32.xlu1 %v407_v4, %s632_s10  ;;  %408 = vrot.lane.b32.xlu2 %v405_v6, %s632_s10 }
  0xca   : > { %280 = vrot.lane.b32.xlu0 %v693_v17, %s633_s11  ;;  %v634_v17 = vmov 0  }
  0xcb   : > { %611 = vset.pattern.permute.xlu1 %v634_v17  ;;  %612 = vset.pattern.permute.xlu0 %v634_v17 }
  0xcc   : > { %319 = vrot.lane.b32.xlu1 %v703_v33, %s627_s5  ;;  %607 = vrot.lane.b32.xlu2 %v606_v55, %s633_s11 }
  0xd4   : > { %429 = vperm.xlu1 %611, %v426_v18  }
  0xea   : > { %v721_v7 = vpop.permute.xlu2 %299 }
 0x106   : > { %v593_v8 = vpop.permute.xlu2 %592  ;;  %v725_v14 = vpop.permute.xlu1 %577 }
 0x107   : > { %v595_v30 = vunpack.i.h.bf16 %v593_v8  ;;  %v594_v31 = vunpack.i.l.bf16 %v593_v8  ;;  %v580_v38 = vunpack.i.h.bf16 %v725_v14  ;;  %v579_v40 = vunpack.i.l.bf16 %v725_v14 }
 0x109   : > { %v359_v47 = vsel %vm358_vm6, %v594_v31, %v595_v30  ;;  %v302_v54 = vsel %vm301_vm12, %v579_v40, %v580_v38  ;;  %v303_v0 = vsel %vm301_vm12, %v580_v38, %v721_v7 }
 0x10e   : > { %v723_v9 = vpop.permute.xlu0 %582  ;;  %v598_v10 = vpop.permute.xlu2 %597 }
 0x10f   : > { %v600_v25 = vunpack.i.h.bf16 %v598_v10  ;;  %v599_v27 = vunpack.i.l.bf16 %v598_v10  ;;  %v585_v32 = vunpack.i.h.bf16 %v723_v9  ;;  %v584_v33 = vunpack.i.l.bf16 %v723_v9 }
 0x111   : > { %v378_v42 = vsel %vm377_vm7, %v599_v27, %v600_v25  ;;  %v322_v48 = vsel %vm321_vm11, %v584_v33, %v585_v32 }
 0x112   : > { %v337_v19 = vpop.permute.xlu1 %336  ;;  %v419_v56 = vsel %vm207_vm0, %v302_v54, %v322_v48 }
 0x116   : > { %v588_v11 = vpop.permute.xlu0 %587  ;;  %v394_v15 = vpop.permute.xlu2 %393 }
 0x117   : > { %v590_v28 = vunpack.i.h.bf16 %v588_v11  ;;  %v589_v29 = vunpack.i.l.bf16 %v588_v11 }
 0x119   : > { %v339_v43 = vsel %vm338_vm9, %v589_v29, %v590_v28  ;;  %v340_v55 = vsel %vm338_vm9, %v590_v28, %v337_v19 }
 0x11a   : > { %v421_v52 = vsel %vm207_vm0, %v339_v43, %v359_v47 }
 0x11e   : > { %v357_v16 = vpop.permute.xlu0 %356  ;;  %v409_v20 = vpop.permute.xlu2 %408 }
 0x11f   : > { %v360_v49 = vsel %vm358_vm6, %v595_v30, %v357_v16 }
 0x120   : > { %v422_v57 = vsel %vm207_vm0, %v340_v55, %v360_v49 }
 0x126   : > { %v376_v21 = vpop.permute.xlu0 %375  ;;  %v608_v26 = vpop.permute.xlu2 %607 }
 0x127   : > { %v610_v36 = vunpack.i.h.bf16 %v608_v26  ;;  %v609_v37 = vunpack.i.l.bf16 %v608_v26  ;;  %v379_v50 = vsel %vm377_vm7, %v600_v25, %v376_v21 }
 0x129   : > { %v283_v51 = vsel %vm282_vm13, %v609_v37, %v610_v36 }
 0x12a   : > { %v417_v58 = vsel %vm207_vm0, %v685_v12, %v283_v51 }
 0x12e   : > { %v603_v22 = vpop.permute.xlu1 %602 }
 0x12f   : > { %v605_v23 = vunpack.i.h.bf16 %v603_v22  ;;  %v604_v24 = vunpack.i.l.bf16 %v603_v22 }
 0x131   : > { %v396_v35 = vsel %vm395_vm8, %v604_v24, %v605_v23  ;;  %v397_v44 = vsel %vm395_vm8, %v605_v23, %v394_v15 }
 0x132   : > { %v423_v45 = vsel %vm207_vm0, %v378_v42, %v396_v35  ;;  %v424_v53 = vsel %vm207_vm0, %v379_v50, %v397_v44 }
 0x134   : > { %v411_v34 = vpop.permute.xlu0 %410 }
 0x135   : > { %v415_v39 = vsel %vm414_vm10, %v409_v20, %v411_v34 }
 0x136   : > { %v413_v41 = vpop.permute.xlu1 %412  ;;  %546 = vmatpush.msk.msra.mxu0 %vm207_vm0, %v415_v39 }
 0x137   : > { %v416_v46 = vsel %vm414_vm10, %v411_v34, %v413_v41 }
 0x138   : > { %452 = vmatpush.msra.mxu0 %v423_v45  ;;  %548 = vmatpush.msk.msra.mxu1 %vm207_vm0, %v416_v46 }
 0x13a   : > { %453 = vmatpush.msra.mxu0 %v421_v52  ;;  %472 = vmatpush.msra.mxu1 %v424_v53 }
 0x13c   : > { %454 = vmatpush.msra.mxu0 %v419_v56  ;;  %473 = vmatpush.msra.mxu1 %v422_v57  ;;  %v281_v59 = vpop.permute.xlu0 %280 }
 0x13d   : > { %v284_v61 = vsel %vm282_vm13, %v610_v36, %v281_v59 }
 0x13e   : > { %v320_v62 = vpop.permute.xlu1 %319  ;;  %455 = vmatpush.msra.mxu0 %v417_v58  ;;  %v418_v1 = vsel %vm207_vm0, %v687_v13, %v284_v61 }
 0x13f   : > { %v323_v63 = vsel %vm321_vm11, %v585_v32, %v320_v62  ;;  %547 = vmatmul.msk.f32.vlgmr.msra.gmra.mxu0 %vm432_vm14, %v425_v60 }
 0x140   : > { %v420_v12 = vsel %vm207_vm0, %v303_v0, %v323_v63 }
 0x141   : > { %474 = vmatpush.msra.mxu1 %v420_v12 }
 0x143   : > { %475 = vmatpush.msra.mxu1 %v418_v1 }
 0x144   : > { %549 = vmatmul.msk.f32.vlgmr.msra.gmra.mxu1 %vm432_vm14, %v425_v60 }
 0x146   : > { %v430_v2 = vpop.permute.xlu1 %429 }
 0x1bc   : > { %v457_v3 = vpop.f32.mrf.mxu0 }
 0x1bd   : > { %v458_v4 = vadd.f32 %v457_v3, %v430_v2 }
 0x1bf   : > { %480 = vst [vmem:[%s197_s21] sm:$0xff] %v458_v4 }
 0x1c1   : > { %v477_v5 = vpop.f32.mrf.mxu1 }
 0x1c2   : > { %v478_v6 = vadd.f32 %v477_v5, %v430_v2 }
 0x1c4   : > { %481 = vst [vmem:[%s197_s21 + $0x8] sm:$0xff] %v478_v6 }
 0x1c5 PF: > { %s14_s15 = sadd.s32 1, %s619_s15  }
 0x1c6   : > { %p11_p4 = scmp.ge.s32.totalorder %s14_s15, 4  }
 0x1c8   :  { %13 = sbr.rel (!%p11_p4) target bundleno = 1 (0x1), region = 79 }

</bundles_post_ra>
